<compile_context>
chip_gen: v6e
topology: v6e:2x2x1
jax: 0.10.0
libtpu: 0.0.40
codegen_flags: <defaults>
</compile_context>

<pallas_src>
import math

import jax
import jax.numpy as jnp
from jax import lax
from jax.experimental import pallas as pl
from jax.experimental.pallas import tpu as pltpu

LANE = 128      # lane width (last dim alignment)
SUBLANE = 8     # sublane group (second-to-last dim alignment)


def _round_up(x, m):
    return (x + m - 1) // m * m


# ---------------------------------------------------------------------------
# Kernel 1: conv-as-GEMM with fused bias + ReLU, computed as  W @ patches^T.
#   x_ref: (TM, K)  bf16  im2col patch tile (pipelined over the grid)
#   w_ref: (Cp, K)  bf16  PyTorch (Cout, Cin*kh*kw) weight, padded, VMEM-resident
#   b_ref: (Cp, 1)  f32   bias
#   o_ref: (Cp, TM) bf16  Cout on sublanes (pad <= 1.33x), M on lanes (dense)
# ---------------------------------------------------------------------------
def _conv_relu_kernel(x_ref, w_ref, b_ref, o_ref):
    acc = lax.dot_general(
        w_ref[...], x_ref[...],
        dimension_numbers=(((1,), (1,)), ((), ())),     # W @ X^T on the MXU
        preferred_element_type=jnp.float32)
    acc = jnp.maximum(acc + b_ref[...], 0.0)            # f32 epilogue (v5e-safe)
    o_ref[...] = acc.astype(o_ref.dtype)


def conv_gemm_relu(patches, w_pad, b_pad, *, tm_max=512):
    """patches: (M, Kp) bf16 with Kp % 128 == 0.  Returns (Cp, Mp) bf16 where
    columns < M hold relu(W @ patches^T + b); caller slices [:Cout, :M]."""
    m, kp = patches.shape
    cp = w_pad.shape[0]
    assert w_pad.shape[1] == kp and kp % LANE == 0 and cp % SUBLANE == 0

    tm = min(tm_max, _round_up(m, LANE))       # output lane axis -> multiple of 128
    m_p = _round_up(m, tm)
    if m_p != m:
        patches = jnp.pad(patches, ((0, m_p - m), (0, 0)))
    grid = (m_p // tm,)

    flops = 2 * m_p * kp * cp
    bytes_accessed = m_p * kp * 2 + cp * kp * 2 + cp * 4 + cp * m_p * 2

    return pl.pallas_call(
        _conv_relu_kernel,
        out_shape=jax.ShapeDtypeStruct((cp, m_p), jnp.bfloat16),
        grid=grid,
        in_specs=[
            pl.BlockSpec((tm, kp), lambda i: (i, 0)),    # patches: pipelined
            pl.BlockSpec((cp, kp), lambda i: (0, 0)),    # weight: VMEM-resident
            pl.BlockSpec((cp, 1), lambda i: (0, 0)),     # bias:   VMEM-resident
        ],
        out_specs=pl.BlockSpec((cp, tm), lambda i: (0, i)),
        compiler_params=pltpu.CompilerParams(
            dimension_semantics=("parallel",)),
        cost_estimate=pl.CostEstimate(flops=int(flops), transcendentals=0,
                                      bytes_accessed=int(bytes_accessed)),
    )(patches, w_pad, b_pad)


# ---------------------------------------------------------------------------
# Kernel 2: fused FC stack  logits = fc3(relu(fc2(relu(fc1(x)))))  in one call.
# All weights stay in PyTorch (out, in) layout, zero-padded to 128 multiples;
# matmuls contract dim 1 of both operands (x @ W^T) on the MXU with f32 acc.
# ---------------------------------------------------------------------------
def _fc3_fused_kernel(x_ref, w1_ref, b1_ref, w2_ref, b2_ref, w3_ref, b3_ref,
                      o_ref):
    dn = (((1,), (1,)), ((), ()))
    h = lax.dot_general(x_ref[...], w1_ref[...], dn,
                        preferred_element_type=jnp.float32)
    h = jnp.maximum(h + b1_ref[...], 0.0).astype(jnp.bfloat16)   # relu(fc1)
    h = lax.dot_general(h, w2_ref[...], dn,
                        preferred_element_type=jnp.float32)
    h = jnp.maximum(h + b2_ref[...], 0.0).astype(jnp.bfloat16)   # relu(fc2)
    h = lax.dot_general(h, w3_ref[...], dn,
                        preferred_element_type=jnp.float32)
    h = h + b3_ref[...]                                          # fc3, no relu
    o_ref[...] = h[:, :o_ref.shape[1]].astype(o_ref.dtype)       # fold [:, :10]


def fc_stack_fused(x, p, *, n_out=10, tm_max=256):
    """x: (M, 256) bf16 flattened features. Returns (M, n_out) f32 logits."""
    m, k1 = x.shape
    n1, n2, n3 = p["fc1_w"].shape[0], p["fc2_w"].shape[0], p["fc3_w"].shape[0]
    assert p["fc1_w"].shape[1] == k1

    tm = min(tm_max, _round_up(m, SUBLANE))
    m_p = _round_up(m, tm)
    if m_p != m:
        x = jnp.pad(x, ((0, m_p - m), (0, 0)))
    grid = (m_p // tm,)

    flops = 2 * m_p * (k1 * n1 + n1 * n2 + n2 * n3)
    bytes_accessed = (m_p * k1 + n1 * k1 + n2 * n1 + n3 * n2) * 2 \
        + (n1 + n2 + n3) * 4 + m_p * n_out * 4

    out = pl.pallas_call(
        _fc3_fused_kernel,
        out_shape=jax.ShapeDtypeStruct((m_p, n_out), jnp.float32),
        grid=grid,
        in_specs=[
            pl.BlockSpec((tm, k1), lambda i: (i, 0)),    # activations: pipelined
            pl.BlockSpec((n1, k1), lambda i: (0, 0)),    # fc1 W (VMEM-resident)
            pl.BlockSpec((1, n1), lambda i: (0, 0)),     # fc1 b
            pl.BlockSpec((n2, n1), lambda i: (0, 0)),    # fc2 W
            pl.BlockSpec((1, n2), lambda i: (0, 0)),     # fc2 b
            pl.BlockSpec((n3, n2), lambda i: (0, 0)),    # fc3 W
            pl.BlockSpec((1, n3), lambda i: (0, 0)),     # fc3 b
        ],
        out_specs=pl.BlockSpec((tm, n_out), lambda i: (i, 0)),
        compiler_params=pltpu.CompilerParams(
            dimension_semantics=("parallel",)),
        cost_estimate=pl.CostEstimate(flops=int(flops), transcendentals=0,
                                      bytes_accessed=int(bytes_accessed)),
    )(x, p["fc1_w"], p["fc1_b"], p["fc2_w"], p["fc2_b"], p["fc3_w"], p["fc3_b"])
    return out[:m]


# ---------------------------------------------------------------------------
# Parameters (PyTorch-style init) and one-time packing (pad + bf16 cast).
# ---------------------------------------------------------------------------
def init_lenet_params(key):
    ks = jax.random.split(key, 10)

    def unif(k, shape, fan_in):
        bound = 1.0 / math.sqrt(fan_in)
        return jax.random.uniform(k, shape, jnp.float32, -bound, bound)

    return {
        "conv1_w": unif(ks[0], (6, 1, 5, 5), 1 * 25),
        "conv1_b": unif(ks[1], (6,), 1 * 25),
        "conv2_w": unif(ks[2], (16, 6, 5, 5), 6 * 25),
        "conv2_b": unif(ks[3], (16,), 6 * 25),
        "fc1_w": unif(ks[4], (120, 256), 256),
        "fc1_b": unif(ks[5], (120,), 256),
        "fc2_w": unif(ks[6], (84, 120), 120),
        "fc2_b": unif(ks[7], (84,), 120),
        "fc3_w": unif(ks[8], (10, 84), 84),
        "fc3_b": unif(ks[9], (10,), 84),
    }


def pack_params_for_pallas(raw):
    """Pad once at init (zeros contribute exactly 0) and cast weights to bf16.
    Conv weights: Cout -> sublane multiple, K -> lane multiple.
    FC weights:   both dims -> 128 multiples (PyTorch (out, in) layout kept)."""
    bf = jnp.bfloat16

    def pad2(a, rows, cols):
        return jnp.pad(a, ((0, rows - a.shape[0]), (0, cols - a.shape[1])))

    w1 = raw["conv1_w"].reshape(6, -1)      # (6, 25)
    w2 = raw["conv2_w"].reshape(16, -1)     # (16, 150)
    return {
        "conv1_w": pad2(w1, 8, _round_up(25, LANE)).astype(bf),            # (8, 128)
        "conv1_b": jnp.pad(raw["conv1_b"], (0, 2)).reshape(8, 1)
                     .astype(jnp.float32),
        "conv2_w": pad2(w2, 16, _round_up(150, LANE)).astype(bf),          # (16, 256)
        "conv2_b": raw["conv2_b"].reshape(16, 1).astype(jnp.float32),
        "fc1_w": pad2(raw["fc1_w"], 128, 256).astype(bf),                  # (128, 256)
        "fc1_b": jnp.pad(raw["fc1_b"], (0, 8)).reshape(1, 128)
                   .astype(jnp.float32),
        "fc2_w": pad2(raw["fc2_w"], 128, 128).astype(bf),                  # (128, 128)
        "fc2_b": jnp.pad(raw["fc2_b"], (0, 44)).reshape(1, 128)
                   .astype(jnp.float32),
        "fc3_w": pad2(raw["fc3_w"], 128, 128).astype(bf),                  # (128, 128)
        "fc3_b": jnp.pad(raw["fc3_b"], (0, 118)).reshape(1, 128)
                   .astype(jnp.float32),
    }


# ---------------------------------------------------------------------------
# LeNet forward: two conv-GEMM Pallas calls + one fused FC Pallas call.
# Patch extraction / 2x2 pooling / tiny transposes are XLA glue on small,
# unpadded arrays.
# ---------------------------------------------------------------------------
def lenet_forward(x, params):
    b = x.shape[0]
    nhwc = ("NHWC", "HWIO", "NHWC")
    xh = x.astype(jnp.bfloat16).reshape(b, 28, 28, 1)        # NCHW(C=1)->NHWC, free

    # conv1 (1->6, 5x5) + ReLU in Pallas; 2x2 maxpool on the tiny (6,B,24,24).
    p1 = lax.conv_general_dilated_patches(xh, (5, 5), (1, 1), "VALID",
                                          dimension_numbers=nhwc)   # (B,24,24,25)
    p1 = p1.reshape(b * 24 * 24, 25)
    p1 = jnp.pad(p1, ((0, 0), (0, params["conv1_w"].shape[1] - 25)))
    y1 = conv_gemm_relu(p1, params["conv1_w"], params["conv1_b"])   # (8, Mp1)
    y1 = y1[:6, :b * 24 * 24].reshape(6, b, 24, 24)
    y1 = y1.reshape(6, b, 12, 2, 12, 2).max(axis=(3, 5))            # (6,B,12,12)

    # conv2 (6->16, 5x5) + ReLU in Pallas; 2x2 maxpool on the tiny (16,B,8,8).
    x2 = y1.transpose(1, 2, 3, 0)                                   # (B,12,12,6) ~7 KiB
    p2 = lax.conv_general_dilated_patches(x2, (5, 5), (1, 1), "VALID",
                                          dimension_numbers=nhwc)   # (B,8,8,150)
    p2 = p2.reshape(b * 8 * 8, 150)
    p2 = jnp.pad(p2, ((0, 0), (0, params["conv2_w"].shape[1] - 150)))
    y2 = conv_gemm_relu(p2, params["conv2_w"], params["conv2_b"])   # (16, Mp2)
    y2 = y2[:, :b * 8 * 8].reshape(16, b, 8, 8)
    y2 = y2.reshape(16, b, 4, 2, 4, 2).max(axis=(3, 5))             # (16,B,4,4)

    # flatten in PyTorch (C,H,W) order, then fused fc1+fc2+fc3 (one pallas_call).
    f = y2.transpose(1, 0, 2, 3).reshape(b, 256)                    # (B,256) bf16
    return fc_stack_fused(f, params, n_out=10)                      # (B,10) f32


# ---------------------------------------------------------------------------
# Pure-JAX f32 reference for correctness check.
# ---------------------------------------------------------------------------
def lenet_reference(x, raw):
    hi = lax.Precision.HIGHEST

    def conv(inp, w, bb):
        y = lax.conv_general_dilated(
            inp, w, (1, 1), "VALID",
            dimension_numbers=("NCHW", "OIHW", "NCHW"), precision=hi)
        return jnp.maximum(y + bb[None, :, None, None], 0.0)

    def pool(inp):
        return lax.reduce_window(inp, -jnp.inf, lax.max,
                                 (1, 1, 2, 2), (1, 1, 2, 2), "VALID")

    y = pool(conv(x, raw["conv1_w"], raw["conv1_b"]))
    y = pool(conv(y, raw["conv2_w"], raw["conv2_b"]))
    f = y.reshape(x.shape[0], -1)
    h = jnp.maximum(jnp.dot(f, raw["fc1_w"].T, precision=hi) + raw["fc1_b"], 0.0)
    h = jnp.maximum(jnp.dot(h, raw["fc2_w"].T, precision=hi) + raw["fc2_b"], 0.0)
    return jnp.dot(h, raw["fc3_w"].T, precision=hi) + raw["fc3_b"]


if __name__ == "__main__":
    key = jax.random.PRNGKey(0)
    k_x, k_p = jax.random.split(key)

    B = 2
    x = jax.random.normal(k_x, (B, 1, 28, 28), jnp.float32)   # FMNIST-like NCHW

    raw = init_lenet_params(k_p)
    params = pack_params_for_pallas(raw)

    fwd = jax.jit(lenet_forward)
    out = jax.block_until_ready(fwd(x, params))
    ref = jax.block_until_ready(lenet_reference(x, raw))

    assert out.shape == (B, 10)
    err = float(jnp.max(jnp.abs(out - ref)))
    # bf16 GEMM inputs (f32 accumulation/epilogue): tolerance relaxed vs the
    # previous all-f32 version, as anticipated in the perf review.
    assert jnp.allclose(out, ref, atol=7.5e-2, rtol=7.5e-2), err

    print("KERNEL_OK")
</pallas_src>

<mosaic_0001>
module attributes {stable_mosaic.version = 11 : i64} {
  func.func @_conv_relu_kernel(%arg0: i32, %arg1: memref<512x128xbf16, #tpu.memory_space<vmem>>, %arg2: memref<8x128xbf16, #tpu.memory_space<vmem>>, %arg3: memref<8x1xf32, #tpu.memory_space<vmem>>, %arg4: memref<8x512xbf16, #tpu.memory_space<vmem>>) attributes {dimension_semantics = [#tpu.dimension_semantics<parallel>], iteration_bounds = array<i64: 3>, scalar_prefetch = 0 : i64, scratch_operands = 0 : i64, tpu.core_type = #tpu.core_type<tc>, window_params = [{transform_indices = @transform_0, window_bounds = array<i64: 512, 128>}, {pipeline_mode = #tpu.pipeline_mode<synchronous>, transform_indices = @transform_1, window_bounds = array<i64: 8, 128>}, {pipeline_mode = #tpu.pipeline_mode<synchronous>, transform_indices = @transform_2, window_bounds = array<i64: 8, 1>}, {transform_indices = @transform_3, window_bounds = array<i64: 8, 512>}]} {
    %c0 = arith.constant 0 : index
    %c0_0 = arith.constant 0 : index
    %0 = vector.load %arg2[%c0, %c0_0] : memref<8x128xbf16, #tpu.memory_space<vmem>>, vector<8x128xbf16>
    %c0_1 = arith.constant 0 : index
    %c0_2 = arith.constant 0 : index
    %1 = vector.load %arg1[%c0_1, %c0_2] : memref<512x128xbf16, #tpu.memory_space<vmem>>, vector<512x128xbf16>
    %cst = arith.constant dense<0.000000e+00> : vector<8x512xf32>
    %2 = tpu.matmul %0, %1, %cst {dimension_numbers = #tpu.dot_dimension_numbers<[1], [1], [0], [0], [0, 0, 1, 0], [], []>} : vector<8x128xbf16>, vector<512x128xbf16>, vector<8x512xf32> -> vector<8x512xf32>
    %c0_3 = arith.constant 0 : index
    %c0_4 = arith.constant 0 : index
    %3 = vector.load %arg3[%c0_3, %c0_4] : memref<8x1xf32, #tpu.memory_space<vmem>>, vector<8x1xf32>
    %4 = vector.broadcast %3 : vector<8x1xf32> to vector<8x512xf32>
    %5 = arith.addf %2, %4 : vector<8x512xf32>
    %cst_5 = arith.constant 0.000000e+00 : f32
    %6 = vector.broadcast %cst_5 : f32 to vector<8x512xf32>
    %7 = arith.maximumf %5, %6 : vector<8x512xf32>
    %8 = arith.truncf %7 : vector<8x512xf32> to vector<8x512xbf16>
    %c0_6 = arith.constant 0 : index
    %c0_7 = arith.constant 0 : index
    %9 = vector.load %arg4[%c0_6, %c0_7] : memref<8x512xbf16, #tpu.memory_space<vmem>>, vector<8x512xbf16>
    tpu.vector_store %arg4[%c0_6, %c0_7], %8 {strides = array<i32>} : memref<8x512xbf16, #tpu.memory_space<vmem>>, vector<8x512xbf16>,
    return
  }
  func.func @transform_0(%arg0: i32) -> (i32, i32) {
    %c0_i32 = arith.constant 0 : i32
    %c0_i32_0 = arith.constant 0 : i32
    return %arg0, %c0_i32 : i32, i32
  }
  func.func @transform_1(%arg0: i32) -> (i32, i32) {
    %c0_i32 = arith.constant 0 : i32
    %c0_i32_0 = arith.constant 0 : i32
    %c0_i32_1 = arith.constant 0 : i32
    return %c0_i32, %c0_i32_0 : i32, i32
  }
  func.func @transform_2(%arg0: i32) -> (i32, i32) {
    %c0_i32 = arith.constant 0 : i32
    %c0_i32_0 = arith.constant 0 : i32
    %c0_i32_1 = arith.constant 0 : i32
    return %c0_i32, %c0_i32_0 : i32, i32
  }
  func.func @transform_3(%arg0: i32) -> (i32, i32) {
    %c0_i32 = arith.constant 0 : i32
    %c0_i32_0 = arith.constant 0 : i32
    return %c0_i32, %arg0 : i32, i32
  }
}

module attributes {stable_mosaic.version = 11 : i64} {
  func.func @_conv_relu_kernel(%arg0: i32, %arg1: memref<128x256xbf16, #tpu.memory_space<vmem>>, %arg2: memref<16x256xbf16, #tpu.memory_space<vmem>>, %arg3: memref<16x1xf32, #tpu.memory_space<vmem>>, %arg4: memref<16x128xbf16, #tpu.memory_space<vmem>>) attributes {dimension_semantics = [#tpu.dimension_semantics<parallel>], iteration_bounds = array<i64: 1>, scalar_prefetch = 0 : i64, scratch_operands = 0 : i64, tpu.core_type = #tpu.core_type<tc>, window_params = [{transform_indices = @transform_0, window_bounds = array<i64: 128, 256>}, {pipeline_mode = #tpu.pipeline_mode<synchronous>, transform_indices = @transform_1, window_bounds = array<i64: 16, 256>}, {pipeline_mode = #tpu.pipeline_mode<synchronous>, transform_indices = @transform_2, window_bounds = array<i64: 16, 1>}, {transform_indices = @transform_3, window_bounds = array<i64: 16, 128>}]} {
    %c0 = arith.constant 0 : index
    %c0_0 = arith.constant 0 : index
    %0 = vector.load %arg2[%c0, %c0_0] : memref<16x256xbf16, #tpu.memory_space<vmem>>, vector<16x256xbf16>
    %c0_1 = arith.constant 0 : index
    %c0_2 = arith.constant 0 : index
    %1 = vector.load %arg1[%c0_1, %c0_2] : memref<128x256xbf16, #tpu.memory_space<vmem>>, vector<128x256xbf16>
    %cst = arith.constant dense<0.000000e+00> : vector<16x128xf32>
    %2 = tpu.matmul %0, %1, %cst {dimension_numbers = #tpu.dot_dimension_numbers<[1], [1], [0], [0], [0, 0, 1, 0], [], []>} : vector<16x256xbf16>, vector<128x256xbf16>, vector<16x128xf32> -> vector<16x128xf32>
    %c0_3 = arith.constant 0 : index
    %c0_4 = arith.constant 0 : index
    %3 = vector.load %arg3[%c0_3, %c0_4] : memref<16x1xf32, #tpu.memory_space<vmem>>, vector<16x1xf32>
    %4 = vector.broadcast %3 : vector<16x1xf32> to vector<16x128xf32>
    %5 = arith.addf %2, %4 : vector<16x128xf32>
    %cst_5 = arith.constant 0.000000e+00 : f32
    %6 = vector.broadcast %cst_5 : f32 to vector<16x128xf32>
    %7 = arith.maximumf %5, %6 : vector<16x128xf32>
    %8 = arith.truncf %7 : vector<16x128xf32> to vector<16x128xbf16>
    %c0_6 = arith.constant 0 : index
    %c0_7 = arith.constant 0 : index
    %9 = vector.load %arg4[%c0_6, %c0_7] : memref<16x128xbf16, #tpu.memory_space<vmem>>, vector<16x128xbf16>
    tpu.vector_store %arg4[%c0_6, %c0_7], %8 {strides = array<i32>} : memref<16x128xbf16, #tpu.memory_space<vmem>>, vector<16x128xbf16>,
    return
  }
  func.func @transform_0(%arg0: i32) -> (i32, i32) {
    %c0_i32 = arith.constant 0 : i32
    %c0_i32_0 = arith.constant 0 : i32
    return %arg0, %c0_i32 : i32, i32
  }
  func.func @transform_1(%arg0: i32) -> (i32, i32) {
    %c0_i32 = arith.constant 0 : i32
    %c0_i32_0 = arith.constant 0 : i32
    %c0_i32_1 = arith.constant 0 : i32
    return %c0_i32, %c0_i32_0 : i32, i32
  }
  func.func @transform_2(%arg0: i32) -> (i32, i32) {
    %c0_i32 = arith.constant 0 : i32
    %c0_i32_0 = arith.constant 0 : i32
    %c0_i32_1 = arith.constant 0 : i32
    return %c0_i32, %c0_i32_0 : i32, i32
  }
  func.func @transform_3(%arg0: i32) -> (i32, i32) {
    %c0_i32 = arith.constant 0 : i32
    %c0_i32_0 = arith.constant 0 : i32
    return %c0_i32, %arg0 : i32, i32
  }
}

module attributes {stable_mosaic.version = 11 : i64} {
  func.func @_fc3_fused_kernel(%arg0: i32, %arg1: memref<8x256xbf16, #tpu.memory_space<vmem>>, %arg2: memref<128x256xbf16, #tpu.memory_space<vmem>>, %arg3: memref<1x128xf32, #tpu.memory_space<vmem>>, %arg4: memref<128x128xbf16, #tpu.memory_space<vmem>>, %arg5: memref<1x128xf32, #tpu.memory_space<vmem>>, %arg6: memref<128x128xbf16, #tpu.memory_space<vmem>>, %arg7: memref<1x128xf32, #tpu.memory_space<vmem>>, %arg8: memref<8x10xf32, #tpu.memory_space<vmem>>) attributes {dimension_semantics = [#tpu.dimension_semantics<parallel>], iteration_bounds = array<i64: 1>, scalar_prefetch = 0 : i64, scratch_operands = 0 : i64, tpu.core_type = #tpu.core_type<tc>, window_params = [{transform_indices = @transform_0, window_bounds = array<i64: 8, 256>}, {pipeline_mode = #tpu.pipeline_mode<synchronous>, transform_indices = @transform_1, window_bounds = array<i64: 128, 256>}, {pipeline_mode = #tpu.pipeline_mode<synchronous>, transform_indices = @transform_2, window_bounds = array<i64: 1, 128>}, {pipeline_mode = #tpu.pipeline_mode<synchronous>, transform_indices = @transform_3, window_bounds = array<i64: 128, 128>}, {pipeline_mode = #tpu.pipeline_mode<synchronous>, transform_indices = @transform_4, window_bounds = array<i64: 1, 128>}, {pipeline_mode = #tpu.pipeline_mode<synchronous>, transform_indices = @transform_5, window_bounds = array<i64: 128, 128>}, {pipeline_mode = #tpu.pipeline_mode<synchronous>, transform_indices = @transform_6, window_bounds = array<i64: 1, 128>}, {transform_indices = @transform_7, window_bounds = array<i64: 8, 10>}]} {
    %c0 = arith.constant 0 : index
    %c0_0 = arith.constant 0 : index
    %0 = vector.load %arg1[%c0, %c0_0] : memref<8x256xbf16, #tpu.memory_space<vmem>>, vector<8x256xbf16>
    %c0_1 = arith.constant 0 : index
    %c0_2 = arith.constant 0 : index
    %1 = vector.load %arg2[%c0_1, %c0_2] : memref<128x256xbf16, #tpu.memory_space<vmem>>, vector<128x256xbf16>
    %cst = arith.constant dense<0.000000e+00> : vector<8x128xf32>
    %2 = tpu.matmul %0, %1, %cst {dimension_numbers = #tpu.dot_dimension_numbers<[1], [1], [0], [0], [0, 0, 1, 0], [], []>} : vector<8x256xbf16>, vector<128x256xbf16>, vector<8x128xf32> -> vector<8x128xf32>
    %c0_3 = arith.constant 0 : index
    %c0_4 = arith.constant 0 : index
    %3 = vector.load %arg3[%c0_3, %c0_4] : memref<1x128xf32, #tpu.memory_space<vmem>>, vector<1x128xf32>
    %4 = vector.broadcast %3 : vector<1x128xf32> to vector<8x128xf32>
    %5 = arith.addf %2, %4 : vector<8x128xf32>
    %cst_5 = arith.constant 0.000000e+00 : f32
    %6 = vector.broadcast %cst_5 : f32 to vector<8x128xf32>
    %7 = arith.maximumf %5, %6 : vector<8x128xf32>
    %8 = arith.truncf %7 : vector<8x128xf32> to vector<8x128xbf16>
    %c0_6 = arith.constant 0 : index
    %c0_7 = arith.constant 0 : index
    %9 = vector.load %arg4[%c0_6, %c0_7] : memref<128x128xbf16, #tpu.memory_space<vmem>>, vector<128x128xbf16>
    %cst_8 = arith.constant dense<0.000000e+00> : vector<8x128xf32>
    %10 = tpu.matmul %8, %9, %cst_8 {dimension_numbers = #tpu.dot_dimension_numbers<[1], [1], [0], [0], [0, 0, 1, 0], [], []>} : vector<8x128xbf16>, vector<128x128xbf16>, vector<8x128xf32> -> vector<8x128xf32>
    %c0_9 = arith.constant 0 : index
    %c0_10 = arith.constant 0 : index
    %11 = vector.load %arg5[%c0_9, %c0_10] : memref<1x128xf32, #tpu.memory_space<vmem>>, vector<1x128xf32>
    %12 = vector.broadcast %11 : vector<1x128xf32> to vector<8x128xf32>
    %13 = arith.addf %10, %12 : vector<8x128xf32>
    %cst_11 = arith.constant 0.000000e+00 : f32
    %14 = vector.broadcast %cst_11 : f32 to vector<8x128xf32>
    %15 = arith.maximumf %13, %14 : vector<8x128xf32>
    %16 = arith.truncf %15 : vector<8x128xf32> to vector<8x128xbf16>
    %c0_12 = arith.constant 0 : index
    %c0_13 = arith.constant 0 : index
    %17 = vector.load %arg6[%c0_12, %c0_13] : memref<128x128xbf16, #tpu.memory_space<vmem>>, vector<128x128xbf16>
    %cst_14 = arith.constant dense<0.000000e+00> : vector<8x128xf32>
    %18 = tpu.matmul %16, %17, %cst_14 {dimension_numbers = #tpu.dot_dimension_numbers<[1], [1], [0], [0], [0, 0, 1, 0], [], []>} : vector<8x128xbf16>, vector<128x128xbf16>, vector<8x128xf32> -> vector<8x128xf32>
    %c0_15 = arith.constant 0 : index
    %c0_16 = arith.constant 0 : index
    %19 = vector.load %arg7[%c0_15, %c0_16] : memref<1x128xf32, #tpu.memory_space<vmem>>, vector<1x128xf32>
    %20 = vector.broadcast %19 : vector<1x128xf32> to vector<8x128xf32>
    %21 = arith.addf %18, %20 : vector<8x128xf32>
    %22 = vector.extract_strided_slice %21 {offsets = [0, 0], sizes = [8, 10], strides = [1, 1]} : vector<8x128xf32> to vector<8x10xf32>
    %c0_17 = arith.constant 0 : index
    %c0_18 = arith.constant 0 : index
    %23 = vector.load %arg8[%c0_17, %c0_18] : memref<8x10xf32, #tpu.memory_space<vmem>>, vector<8x10xf32>
    tpu.vector_store %arg8[%c0_17, %c0_18], %22 {strides = array<i32>} : memref<8x10xf32, #tpu.memory_space<vmem>>, vector<8x10xf32>,
    return
  }
  func.func @transform_0(%arg0: i32) -> (i32, i32) {
    %c0_i32 = arith.constant 0 : i32
    %c0_i32_0 = arith.constant 0 : i32
    return %arg0, %c0_i32 : i32, i32
  }
  func.func @transform_1(%arg0: i32) -> (i32, i32) {
    %c0_i32 = arith.constant 0 : i32
    %c0_i32_0 = arith.constant 0 : i32
    %c0_i32_1 = arith.constant 0 : i32
    return %c0_i32, %c0_i32_0 : i32, i32
  }
  func.func @transform_2(%arg0: i32) -> (i32, i32) {
    %c0_i32 = arith.constant 0 : i32
    %c0_i32_0 = arith.constant 0 : i32
    %c0_i32_1 = arith.constant 0 : i32
    return %c0_i32, %c0_i32_0 : i32, i32
  }
  func.func @transform_3(%arg0: i32) -> (i32, i32) {
    %c0_i32 = arith.constant 0 : i32
    %c0_i32_0 = arith.constant 0 : i32
    %c0_i32_1 = arith.constant 0 : i32
    return %c0_i32, %c0_i32_0 : i32, i32
  }
  func.func @transform_4(%arg0: i32) -> (i32, i32) {
    %c0_i32 = arith.constant 0 : i32
    %c0_i32_0 = arith.constant 0 : i32
    %c0_i32_1 = arith.constant 0 : i32
    return %c0_i32, %c0_i32_0 : i32, i32
  }
  func.func @transform_5(%arg0: i32) -> (i32, i32) {
    %c0_i32 = arith.constant 0 : i32
    %c0_i32_0 = arith.constant 0 : i32
    %c0_i32_1 = arith.constant 0 : i32
    return %c0_i32, %c0_i32_0 : i32, i32
  }
  func.func @transform_6(%arg0: i32) -> (i32, i32) {
    %c0_i32 = arith.constant 0 : i32
    %c0_i32_0 = arith.constant 0 : i32
    %c0_i32_1 = arith.constant 0 : i32
    return %c0_i32, %c0_i32_0 : i32, i32
  }
  func.func @transform_7(%arg0: i32) -> (i32, i32) {
    %c0_i32 = arith.constant 0 : i32
    %c0_i32_0 = arith.constant 0 : i32
    return %arg0, %c0_i32 : i32, i32
  }
}

</mosaic_0001>

<bundles_post_ra>
// kernel: lenet_forward.3
= control target key start
LH: loop header
LB: loop body
LE: loop exit
PB: predicated region body
PF: predicated region fallthrough
CT: control target
= control target key end

     0   :  { %s752_s12 = smov 0   ;;  %s819_s0 = inlined_call_operand.vmem [shape: bf16[1536,128], index: 0, kind: input, shape index: {}]   ;;  %s820_s1 = inlined_call_operand.vmem [shape: bf16[8,128], index: 1, kind: input, shape index: {}]   ;;  %s821_s2 = inlined_call_operand.vmem [shape: f32[8,1], index: 2, kind: input, shape index: {}]   ;;  %s822_s3 = inlined_call_operand.vmem [shape: bf16[8,1536], index: 3, kind: output, shape index: {}]  }
   0x1 LB: > { %s598_s13 = sadd.s32 4294967295, %s729_s12   ;;  %p602_p0 = scmp.ge.s32.totalorder %s729_s12, 1  ;;  %s729_s12 = sphi %s752_s12, %s13_s12  }
   0x2   : > { %p138_p1 = scmp.lt.s32.totalorder %s729_s12, 4 }
   0x4   : > { %p139_p2 = pnand %p602_p0, %p138_p1 }
   0x5   : > { %s603_s14 = sshll.u32 (!%p139_p2), %s598_s13, 6  ;;  %s605_s23 = sshll.u32 (!%p139_p2), %s598_s13, 2 }
   0x6   : > { %142 = sbr.rel (%p139_p2) target bundleno = 283 (0x11b), region = 32  ;;  %p163_p3 = scmp.lt.s32.totalorder (!%p139_p2), %s603_s14, 191 }
   0x7   : > { %p169_p4 = scmp.lt.s32.totalorder (!%p139_p2), %s605_s23, 11 }
   0xb   : > { %v765_v0 = vld [vmem:[%s820_s1] sm:$0xf]  ;;  %v731_v2 = vmov 0   ;;  %s824_s14 = smov (!%p163_p3, %s603_s14), 191  ;;  %s826_s23 = smov (!%p169_p4, %s605_s23), 11 }
   0xc   : > { %v240_v1 = vld [vmem:[%s821_s2] sm:$0xff]  ;;  %661 = vmatprep.mubr.bf16.mxu0 %v765_v0  ;;  %679 = vmatprep.mubr.bf16.mxu1 %v765_v0  ;;  %s604_s19 = sshll.u32 %s824_s14, 2  ;;  %s606_s24 = sshll.u32 %s826_s23, 2 }
   0xd   : > { %690 = vset.pattern.permute.xlu0 %v731_v2  ;;  %s775_s22 = scalar_lea.vmem %s819_s0, %s604_s19  ;;  %s172_s27 = scalar_lea.vmem %s822_s3, %s606_s24 }
   0xe   : > { %243 = vperm.xlu0 %690, %v240_v1   ;;  %v691_v3 = vld [vmem:[%s775_s22 + $0x78] sm:$0xff]   ;;  %v695_v7 = vld [vmem:[%s775_s22 + $0x70] sm:$0xff]   ;;  %v699_v11 = vld [vmem:[%s775_s22 + $0x68] sm:$0xff]  }
   0xf   : > { %v692_v4 = vld [vmem:[%s775_s22 + $0xf8] sm:$0xff]   ;;  %645 = vmatprep.subr.bf16.mxu0 %v691_v3  ;;  %v696_v8 = vld [vmem:[%s775_s22 + $0xf0] sm:$0xff]   ;;  %v700_v12 = vld [vmem:[%s775_s22 + $0xe8] sm:$0xff]  }
  0x10   : > { %v693_v5 = vld [vmem:[%s775_s22 + $0x38] sm:$0xff]   ;;  %663 = vmatprep.subr.bf16.mxu1 %v692_v4  ;;  %v697_v9 = vld [vmem:[%s775_s22 + $0x30] sm:$0xff]   ;;  %v701_v13 = vld [vmem:[%s775_s22 + $0x28] sm:$0xff]  }
  0x11   : > { %v694_v6 = vld [vmem:[%s775_s22 + $0xb8] sm:$0xff]   ;;  %646 = vmatpush3.bf16.xpose.msra.mxu0 %v693_v5  ;;  %v698_v10 = vld [vmem:[%s775_s22 + $0xb0] sm:$0xff]   ;;  %v702_v14 = vld [vmem:[%s775_s22 + $0xa8] sm:$0xff]  }
  0x12   : > { %664 = vmatpush3.bf16.xpose.msra.mxu1 %v694_v6  ;;  %647 = vmatprep.subr.bf16.mxu0 %v695_v7  ;;  %v703_v15 = vld [vmem:[%s775_s22 + $0x60] sm:$0xff]   ;;  %v707_v19 = vld [vmem:[%s775_s22 + $0x58] sm:$0xff]   ;;  %v711_v23 = vld [vmem:[%s775_s22 + $0x50] sm:$0xff]  }
  0x13   : > { %665 = vmatprep.subr.bf16.mxu1 %v696_v8  ;;  %v704_v16 = vld [vmem:[%s775_s22 + $0xe0] sm:$0xff]   ;;  %v708_v20 = vld [vmem:[%s775_s22 + $0xd8] sm:$0xff]   ;;  %v712_v24 = vld [vmem:[%s775_s22 + $0xd0] sm:$0xff]  }
  0x14   : > { %v705_v17 = vld [vmem:[%s775_s22 + $0x20] sm:$0xff]   ;;  %v709_v21 = vld [vmem:[%s775_s22 + $0x18] sm:$0xff]   ;;  %v713_v25 = vld [vmem:[%s775_s22 + $0x10] sm:$0xff]  }
  0x15   : > { %v706_v18 = vld [vmem:[%s775_s22 + $0xa0] sm:$0xff]   ;;  %v710_v22 = vld [vmem:[%s775_s22 + $0x98] sm:$0xff]   ;;  %v714_v26 = vld [vmem:[%s775_s22 + $0x90] sm:$0xff]  }
  0x16   : > { %v715_v27 = vld [vmem:[%s775_s22 + $0x48] sm:$0xff]   ;;  %v719_v31 = vld [vmem:[%s775_s22 + $0x40] sm:$0xff]  }
  0x17   : > { %v716_v28 = vld [vmem:[%s775_s22 + $0xc8] sm:$0xff]   ;;  %v720_v32 = vld [vmem:[%s775_s22 + $0xc0] sm:$0xff]  }
  0x18   : > { %v717_v29 = vld [vmem:[%s775_s22 + $0x8] sm:$0xff]   ;;  %v721_v33 = vld [vmem:[%s775_s22] sm:$0xff]  }
  0x19   : > { %648 = vmatpush3.bf16.xpose.msra.mxu0 %v697_v9  ;;  %v718_v30 = vld [vmem:[%s775_s22 + $0x88] sm:$0xff]   ;;  %v722_v34 = vld [vmem:[%s775_s22 + $0x80] sm:$0xff]  }
  0x1a   : > { %666 = vmatpush3.bf16.xpose.msra.mxu1 %v698_v10  ;;  %649 = vmatprep.subr.bf16.mxu0 %v699_v11 }
  0x1b   : > { %667 = vmatprep.subr.bf16.mxu1 %v700_v12 }
  0x21   : > { %650 = vmatpush3.bf16.xpose.msra.mxu0 %v701_v13 }
  0x22   : > { %668 = vmatpush3.bf16.xpose.msra.mxu1 %v702_v14  ;;  %651 = vmatprep.subr.bf16.mxu0 %v703_v15 }
  0x23   : > { %669 = vmatprep.subr.bf16.mxu1 %v704_v16 }
  0x29   : > { %652 = vmatpush3.bf16.xpose.msra.mxu0 %v705_v17 }
  0x2a   : > { %670 = vmatpush3.bf16.xpose.msra.mxu1 %v706_v18  ;;  %653 = vmatprep.subr.bf16.mxu0 %v707_v19 }
  0x2b   : > { %671 = vmatprep.subr.bf16.mxu1 %v708_v20 }
  0x31   : > { %654 = vmatpush3.bf16.xpose.msra.mxu0 %v709_v21 }
  0x32   : > { %672 = vmatpush3.bf16.xpose.msra.mxu1 %v710_v22  ;;  %655 = vmatprep.subr.bf16.mxu0 %v711_v23 }
  0x33   : > { %673 = vmatprep.subr.bf16.mxu1 %v712_v24 }
  0x39   : > { %656 = vmatpush3.bf16.xpose.msra.mxu0 %v713_v25 }
  0x3a   : > { %674 = vmatpush3.bf16.xpose.msra.mxu1 %v714_v26  ;;  %657 = vmatprep.subr.bf16.mxu0 %v715_v27 }
  0x3b   : > { %675 = vmatprep.subr.bf16.mxu1 %v716_v28 }
  0x41   : > { %658 = vmatpush3.bf16.xpose.msra.mxu0 %v717_v29 }
  0x42   : > { %676 = vmatpush3.bf16.xpose.msra.mxu1 %v718_v30  ;;  %659 = vmatprep.subr.bf16.mxu0 %v719_v31 }
  0x43   : > { %677 = vmatprep.subr.bf16.mxu1 %v720_v32 }
  0x49   : > { %660 = vmatpush3.bf16.xpose.msra.mxu0 %v721_v33 }
  0x4a   : > { %678 = vmatpush3.bf16.xpose.msra.mxu1 %v722_v34 }
  0x50   : > { %662 = vmatmul.mubr.bf16.vlgmr.msra.gmra.mxu0 %v765_v0 }
  0x51   : > { %680 = vmatmul.mubr.bf16.vlgmr.msra.gmra.mxu1 %v765_v0 }
  0x89   : > { %v244_v35 = vpop.permute.xlu0 %243 }
 0x110   : > { %v472_v36 = vpop.f32.mrf.mxu0 }
 0x111   : > { %v473_v37 = vadd.f32 %v472_v36, %v244_v35  ;;  %v513_v38 = vpop.f32.mrf.mxu1 }
 0x112   : > { %v514_v39 = vadd.f32 %v513_v38, %v244_v35  ;;  %v474_v40 = vpop.f32.mrf.mxu0 }
 0x113   : > { %v475_v41 = vadd.f32 %v474_v40, %v244_v35  ;;  %v515_v42 = vpop.f32.mrf.mxu1  ;;  %v520_v45 = vmax.f32 %v473_v37, 0.0 }
 0x114   : > { %v516_v43 = vadd.f32 %v515_v42, %v244_v35  ;;  %v476_v44 = vpop.f32.mrf.mxu0  ;;  %v522_v48 = vmax.f32 %v514_v39, 0.0 }
 0x115   : > { %v521_v46 = vmax.f32 %v475_v41, 0.0  ;;  %v517_v47 = vpop.f32.mrf.mxu1 }
 0x116   : > { %v523_v49 = vmax.f32 %v516_v43, 0.0  ;;  %v477_v50 = vpop.f32.mrf.mxu0 }
 0x117   : > { %v643_v51 = vpack.c.bf16 %v521_v46, %v520_v45  ;;  %v518_v52 = vpop.f32.mrf.mxu1 }
 0x118   : > { %v644_v53 = vpack.c.bf16 %v523_v49, %v522_v48 }
 0x119   : > { %540 = vst [vmem:[%s172_s27] sm:$0xff] %v643_v51 }
 0x11a   : > { %541 = vst [vmem:[%s172_s27 + $0x8] sm:$0xff] %v644_v53 }
 0x11b PF: > { %s13_s12 = sadd.s32 1, %s729_s12  }
 0x11c   : > { %p10_p5 = scmp.ge.s32.totalorder %s13_s12, 5  }
 0x11e   :  { %12 = sbr.rel (!%p10_p5) target bundleno = 1 (0x1), region = 62 }

// kernel: lenet_forward.4
= control target key start
LH: loop header
LB: loop body
LE: loop exit
PB: predicated region body
PF: predicated region fallthrough
CT: control target
= control target key end

     0   :  { %v248_v1 = vmov 0   ;;  %s332_s0 = inlined_call_operand.vmem [shape: bf16[128,256], index: 0, kind: input, shape index: {}]   ;;  %s333_s1 = inlined_call_operand.vmem [shape: bf16[16,256], index: 1, kind: input, shape index: {}]   ;;  %s334_s2 = inlined_call_operand.vmem [shape: f32[16,1], index: 2, kind: input, shape index: {}]   ;;  %s335_s3 = inlined_call_operand.vmem [shape: bf16[16,128], index: 3, kind: output, shape index: {}]  }
   0x1   :  { %v221_v0 = vld [vmem:[%s332_s0 + $0x74] ss:$8 sps:$4 sm:$0xff]   ;;  %220 = vset.pattern.permute.xlu0 %v248_v1  ;;  %v223_v2 = vld [vmem:[%s332_s0 + $0x70] ss:$8 sps:$4 sm:$0xff]   ;;  %v224_v3 = vld [vmem:[%s332_s0 + $0x64] ss:$8 sps:$4 sm:$0xff]  }
   0x2   :  { %135 = vmatprep.subr.bf16.mxu0 %v221_v0  ;;  %v226_v4 = vld [vmem:[%s332_s0 + $0x60] ss:$8 sps:$4 sm:$0xff]   ;;  %v227_v5 = vld [vmem:[%s332_s0 + $0x54] ss:$8 sps:$4 sm:$0xff]   ;;  %v247_v6 = vld [vmem:[%s333_s1 + $0x4] ss:$8 sps:$4 sm:$0xff]  }
   0x3   :  { %136 = vmatpush1.bf16.xpose.msra.mxu0 %v223_v2  ;;  %v33_v7 = vld [vmem:[%s334_s2] sm:$0xff]  ;;  %167 = vmatprep.mubr.bf16.mxu0 %v247_v6  ;;  %v34_v8 = vld [vmem:[%s334_s2 + $0x8] sm:$0xff]  ;;  %v229_v9 = vld [vmem:[%s332_s0 + $0x50] ss:$8 sps:$4 sm:$0xff]  }
   0x4   :  { %137 = vmatprep.subr.bf16.mxu0 %v224_v3  ;;  %37 = vperm.xlu0 %220, %v33_v7   ;;  %v230_v10 = vld [vmem:[%s332_s0 + $0x44] ss:$8 sps:$4 sm:$0xff]   ;;  %v232_v11 = vld [vmem:[%s332_s0 + $0x40] ss:$8 sps:$4 sm:$0xff]   ;;  %v233_v12 = vld [vmem:[%s332_s0 + $0x34] ss:$8 sps:$4 sm:$0xff]  }
   0x5   :  { %v235_v13 = vld [vmem:[%s332_s0 + $0x30] ss:$8 sps:$4 sm:$0xff]   ;;  %v236_v14 = vld [vmem:[%s332_s0 + $0x24] ss:$8 sps:$4 sm:$0xff]   ;;  %v238_v15 = vld [vmem:[%s332_s0 + $0x20] ss:$8 sps:$4 sm:$0xff]  }
   0x6   :  { %v239_v16 = vld [vmem:[%s332_s0 + $0x14] ss:$8 sps:$4 sm:$0xff]   ;;  %v241_v17 = vld [vmem:[%s332_s0 + $0x10] ss:$8 sps:$4 sm:$0xff]   ;;  %v242_v18 = vld [vmem:[%s332_s0 + $0x4] ss:$8 sps:$4 sm:$0xff]  }
   0x7   :  { %v244_v19 = vld [vmem:[%s332_s0] ss:$8 sps:$4 sm:$0xff]  }
   0x8   :  { %42 = vperm.xlu0 %220, %v34_v8   ;;  %v245_v20 = vld [vmem:[%s333_s1] ss:$8 sps:$4 sm:$0xff]  }
   0xb   :  { %138 = vmatpush1.bf16.xpose.msra.mxu0 %v226_v4 }
   0xc   :  { %139 = vmatprep.subr.bf16.mxu0 %v227_v5 }
  0x13   :  { %140 = vmatpush1.bf16.xpose.msra.mxu0 %v229_v9 }
  0x14   :  { %141 = vmatprep.subr.bf16.mxu0 %v230_v10 }
  0x1b   :  { %142 = vmatpush1.bf16.xpose.msra.mxu0 %v232_v11 }
  0x1c   :  { %143 = vmatprep.subr.bf16.mxu0 %v233_v12 }
  0x23   :  { %144 = vmatpush1.bf16.xpose.msra.mxu0 %v235_v13 }
  0x24   :  { %145 = vmatprep.subr.bf16.mxu0 %v236_v14 }
  0x2b   :  { %146 = vmatpush1.bf16.xpose.msra.mxu0 %v238_v15 }
  0x2c   :  { %147 = vmatprep.subr.bf16.mxu0 %v239_v16 }
  0x33   :  { %148 = vmatpush1.bf16.xpose.msra.mxu0 %v241_v17 }
  0x34   :  { %149 = vmatprep.subr.bf16.mxu0 %v242_v18 }
  0x3b   :  { %150 = vmatpush1.bf16.xpose.msra.mxu0 %v244_v19 }
  0x42   :  { %168 = vmatmul.mubr.bf16.vlgmr.msra.gmra.mxu0 %v245_v20 }
  0x7f   :  { %v38_v21 = vpop.permute.xlu0 %37 }
  0x83   :  { %v43_v25 = vpop.permute.xlu0 %42 }
 0x102   :  { %v169_v22 = vpop.f32.mrf.mxu0 }
 0x103   :  { %v170_v24 = vadd.f32 %v169_v22, %v38_v21 }
 0x104   :  { %v171_v23 = vpop.f32.mrf.mxu0 }
 0x105   :  { %v176_v29 = vmax.f32 %v170_v24, 0.0 }
 0x106   :  { %v172_v26 = vpop.f32.mrf.mxu0 }
 0x107   :  { %v173_v27 = vadd.f32 %v172_v26, %v43_v25 }
 0x108   :  { %v174_v28 = vpop.f32.mrf.mxu0 }
 0x109   :  { %v177_v30 = vmax.f32 %v173_v27, 0.0 }
 0x10b   :  { %v217_v31 = vpack.c.bf16 %v177_v30, %v176_v29 }
 0x10d   :  { %218 = vst [vmem:[%s335_s3] sm:$0xff] %v217_v31  }

// kernel: lenet_forward.5
= control target key start
LH: loop header
LB: loop body
LE: loop exit
PB: predicated region body
PF: predicated region fallthrough
CT: control target
= control target key end

     0   :  { %v549_v1 = vmov 0.0   ;;  %vm550_vm0 = vmmov 0   ;;  %vm404_vm1 = vcmask 80896   ;;  %s720_s1 = inlined_call_operand.vmem [shape: bf16[128,256], index: 1, kind: input, shape index: {}]   ;;  %s721_s0 = inlined_call_operand.vmem [shape: bf16[8,256], index: 0, kind: input, shape index: {}]   ;;  %s722_s3 = inlined_call_operand.vmem [shape: bf16[128,128], index: 3, kind: input, shape index: {}]   ;;  %s723_s5 = inlined_call_operand.vmem [shape: bf16[128,128], index: 5, kind: input, shape index: {}]   ;;  %s724_s2 = inlined_call_operand.vmem [shape: f32[1,128], index: 2, kind: input, shape index: {}]   ;;  %s725_s4 = inlined_call_operand.vmem [shape: f32[1,128], index: 4, kind: input, shape index: {}]   ;;  %s726_s6 = inlined_call_operand.vmem [shape: f32[1,128], index: 6, kind: input, shape index: {}]   ;;  %s727_s7 = inlined_call_operand.vmem [shape: f32[8,10], index: 7, kind: output, shape index: {}]  }
   0x1   :  { %v507_v0 = vld [vmem:[%s720_s1 + $0x74] ss:$8 sps:$4 sm:$0xff]   ;;  %465 = vmatprep.subr.bf16.mxu1 %v549_v1  ;;  %v509_v2 = vld [vmem:[%s720_s1 + $0x70] ss:$8 sps:$4 sm:$0xff]   ;;  %v510_v3 = vld [vmem:[%s720_s1 + $0x64] ss:$8 sps:$4 sm:$0xff]   ;;  %481 = vmatprep.mubr.msk.bf16.mxu1 %vm550_vm0, %v549_v1 }
   0x2   :  { %138 = vmatprep.subr.bf16.mxu0 %v507_v0  ;;  %v512_v4 = vld [vmem:[%s720_s1 + $0x60] ss:$8 sps:$4 sm:$0xff]   ;;  %v513_v5 = vld [vmem:[%s720_s1 + $0x54] ss:$8 sps:$4 sm:$0xff]   ;;  %v515_v9 = vld [vmem:[%s720_s1 + $0x50] ss:$8 sps:$4 sm:$0xff]  }
   0x3   :  { %139 = vmatpush1.bf16.xpose.msra.mxu0 %v509_v2  ;;  %v27_v6 = vld [vmem:[%s721_s0] sm:$0xff]  ;;  %v533_v8 = vld [vmem:[%s722_s3 + $0x38] sm:$0xff]   ;;  %v534_v11 = vld [vmem:[%s722_s3 + $0x30] sm:$0xff]  }
   0x4   :  { %140 = vmatprep.subr.bf16.mxu0 %v510_v3  ;;  %v412_v7 = vcombine.high %v27_v6, %v27_v6  ;;  %466 = vmatpush3.bf16.xpose.msra.mxu1 %v533_v8  ;;  %v516_v10 = vld [vmem:[%s720_s1 + $0x44] ss:$8 sps:$4 sm:$0xff]   ;;  %v518_v12 = vld [vmem:[%s720_s1 + $0x40] ss:$8 sps:$4 sm:$0xff]   ;;  %v519_v13 = vld [vmem:[%s720_s1 + $0x34] ss:$8 sps:$4 sm:$0xff]   ;;  %v411_v26 = vcombine.low %v27_v6, %v27_v6 }
   0x5   :  { %467 = vmatprep.subr.bf16.mxu1 %v549_v1  ;;  %v535_v14 = vld [vmem:[%s722_s3 + $0x28] sm:$0xff]   ;;  %v521_v15 = vld [vmem:[%s720_s1 + $0x30] ss:$8 sps:$4 sm:$0xff]   ;;  %v536_v17 = vld [vmem:[%s722_s3 + $0x20] sm:$0xff]  }
   0x6   :  { %170 = vmatprep.mubr.bf16.mxu0 %v412_v7  ;;  %v522_v16 = vld [vmem:[%s720_s1 + $0x24] ss:$8 sps:$4 sm:$0xff]   ;;  %v524_v18 = vld [vmem:[%s720_s1 + $0x20] ss:$8 sps:$4 sm:$0xff]   ;;  %v525_v19 = vld [vmem:[%s720_s1 + $0x14] ss:$8 sps:$4 sm:$0xff]  }
   0x7   :  { %v537_v20 = vld [vmem:[%s722_s3 + $0x18] sm:$0xff]   ;;  %v528_v22 = vld [vmem:[%s720_s1 + $0x4] ss:$8 sps:$4 sm:$0xff]   ;;  %v538_v23 = vld [vmem:[%s722_s3 + $0x10] sm:$0xff]  }
   0x8   :  { %v527_v21 = vld [vmem:[%s720_s1 + $0x10] ss:$8 sps:$4 sm:$0xff]   ;;  %v530_v24 = vld [vmem:[%s720_s1] ss:$8 sps:$4 sm:$0xff]  }
   0x9   :  { %v539_v25 = vld [vmem:[%s722_s3 + $0x8] sm:$0xff]   ;;  %v540_v27 = vld [vmem:[%s722_s3] sm:$0xff]   ;;  %v541_v28 = vld [vmem:[%s723_s5 + $0x38] sm:$0xff]  }
   0xa   :  { %v542_v29 = vld [vmem:[%s723_s5 + $0x30] sm:$0xff]   ;;  %v543_v30 = vld [vmem:[%s723_s5 + $0x28] sm:$0xff]   ;;  %v544_v31 = vld [vmem:[%s723_s5 + $0x20] sm:$0xff]  }
   0xb   :  { %141 = vmatpush1.bf16.xpose.msra.mxu0 %v512_v4  ;;  %v545_v32 = vld [vmem:[%s723_s5 + $0x18] sm:$0xff]   ;;  %v546_v33 = vld [vmem:[%s723_s5 + $0x10] sm:$0xff]   ;;  %v547_v34 = vld [vmem:[%s723_s5 + $0x8] sm:$0xff]  }
   0xc   :  { %142 = vmatprep.subr.bf16.mxu0 %v513_v5  ;;  %468 = vmatpush3.bf16.xpose.msra.mxu1 %v534_v11  ;;  %v410_v35 = vld [vmem:[%s724_s2] ss:$0 sm:$0xff] }
   0xd   :  { %469 = vmatprep.subr.bf16.mxu1 %v549_v1  ;;  %v548_v43 = vld [vmem:[%s723_s5] sm:$0xff]  }
   0xe   :  { %v429_v44 = vld [vmem:[%s725_s4] ss:$0 sm:$0xff] }
   0xf   :  { %v438_v52 = vld [vmem:[%s726_s6] ss:$0 sm:$0xff] }
  0x13   :  { %143 = vmatpush1.bf16.xpose.msra.mxu0 %v515_v9 }
  0x14   :  { %144 = vmatprep.subr.bf16.mxu0 %v516_v10  ;;  %470 = vmatpush3.bf16.xpose.msra.mxu1 %v535_v14 }
  0x15   :  { %471 = vmatprep.subr.bf16.mxu1 %v549_v1 }
  0x1b   :  { %145 = vmatpush1.bf16.xpose.msra.mxu0 %v518_v12 }
  0x1c   :  { %146 = vmatprep.subr.bf16.mxu0 %v519_v13  ;;  %472 = vmatpush3.bf16.xpose.msra.mxu1 %v536_v17 }
  0x1d   :  { %473 = vmatprep.subr.bf16.mxu1 %v549_v1 }
  0x23   :  { %147 = vmatpush1.bf16.xpose.msra.mxu0 %v521_v15 }
  0x24   :  { %148 = vmatprep.subr.bf16.mxu0 %v522_v16  ;;  %474 = vmatpush3.bf16.xpose.msra.mxu1 %v537_v20 }
  0x25   :  { %475 = vmatprep.subr.bf16.mxu1 %v549_v1 }
  0x2b   :  { %149 = vmatpush1.bf16.xpose.msra.mxu0 %v524_v18 }
  0x2c   :  { %150 = vmatprep.subr.bf16.mxu0 %v525_v19  ;;  %476 = vmatpush3.bf16.xpose.msra.mxu1 %v538_v23 }
  0x2d   :  { %477 = vmatprep.subr.bf16.mxu1 %v549_v1 }
  0x33   :  { %151 = vmatpush1.bf16.xpose.msra.mxu0 %v527_v21 }
  0x34   :  { %152 = vmatprep.subr.bf16.mxu0 %v528_v22  ;;  %478 = vmatpush3.bf16.xpose.msra.mxu1 %v539_v25 }
  0x35   :  { %479 = vmatprep.subr.bf16.mxu1 %v549_v1 }
  0x3b   :  { %153 = vmatpush1.bf16.xpose.msra.mxu0 %v530_v24 }
  0x3c   :  { %485 = vmatprep.subr.bf16.mxu0 %v549_v1  ;;  %480 = vmatpush3.bf16.xpose.msra.mxu1 %v540_v27 }
  0x42   :  { %171 = vmatmul.mubr.bf16.vlgmr.msra.gmra.mxu0 %v411_v26 }
  0x43   :  { %501 = vmatprep.mubr.msk.bf16.mxu0 %vm550_vm0, %v549_v1  ;;  %486 = vmatpush3.bf16.xpose.msra.mxu0 %v541_v28 }
  0x44   :  { %487 = vmatprep.subr.bf16.mxu0 %v549_v1 }
  0x4b   :  { %488 = vmatpush3.bf16.xpose.msra.mxu0 %v542_v29 }
  0x4c   :  { %489 = vmatprep.subr.bf16.mxu0 %v549_v1 }
  0x53   :  { %490 = vmatpush3.bf16.xpose.msra.mxu0 %v543_v30 }
  0x54   :  { %491 = vmatprep.subr.bf16.mxu0 %v549_v1 }
  0x5b   :  { %492 = vmatpush3.bf16.xpose.msra.mxu0 %v544_v31 }
  0x5c   :  { %493 = vmatprep.subr.bf16.mxu0 %v549_v1 }
  0x63   :  { %494 = vmatpush3.bf16.xpose.msra.mxu0 %v545_v32 }
  0x64   :  { %495 = vmatprep.subr.bf16.mxu0 %v549_v1 }
  0x6b   :  { %496 = vmatpush3.bf16.xpose.msra.mxu0 %v546_v33 }
  0x6c   :  { %497 = vmatprep.subr.bf16.mxu0 %v549_v1 }
  0x73   :  { %498 = vmatpush3.bf16.xpose.msra.mxu0 %v547_v34 }
  0x74   :  { %499 = vmatprep.subr.bf16.mxu0 %v549_v1 }
  0x7b   :  { %500 = vmatpush3.bf16.xpose.msra.mxu0 %v548_v43 }
 0x102   :  { %v172_v36 = vpop.f32.mrf.mxu0 }
 0x103   :  { %v173_v37 = vadd.f32 %v410_v35, %v172_v36 }
 0x104   :  { %v174_v38 = vpop.f32.mrf.mxu0 }
 0x105   :  { %v178_v39 = vmax.f32 %v173_v37, 0.0 }
 0x106   :  { %v175_v40 = vpop.f32.mrf.mxu0 }
 0x107   :  { %v179_v41 = vpack.c.bf16 %v178_v39, %v178_v39 }
 0x108   :  { %v176_v42 = vpop.f32.mrf.mxu0 }
 0x109   :  { %482 = vmatmul.mubr.bf16.vlgmr.msra.gmra.mxu1 %v179_v41 }
 0x1c9   :  { %v285_v45 = vpop.f32.mrf.mxu1 }
 0x1ca   :  { %v286_v46 = vadd.f32 %v429_v44, %v285_v45 }
 0x1cb   :  { %v483_v47 = vpop.f32.mrf.mxu1 }
 0x1cc   :  { %v291_v48 = vmax.f32 %v286_v46, 0.0 }
 0x1cd   :  { %v288_v49 = vpop.f32.mrf.mxu1 }
 0x1ce   :  { %v292_v50 = vpack.c.bf16 %v291_v48, %v291_v48 }
 0x1cf   :  { %v484_v51 = vpop.f32.mrf.mxu1 }
 0x1d0   :  { %502 = vmatmul.mubr.bf16.vlgmr.msra.gmra.mxu0 %v292_v50 }
 0x290   :  { %v398_v53 = vpop.f32.mrf.mxu0 }
 0x291   :  { %v399_v54 = vadd.f32 %v438_v52, %v398_v53 }
 0x292   :  { %v503_v55 = vpop.f32.mrf.mxu0 }
 0x293   :  { %405 = vst.msk [vmem:[%s727_s7] sm:$0xff] %vm404_vm1, %v399_v54 }
 0x294   :  { %v401_v56 = vpop.f32.mrf.mxu0 }
 0x296   :  { %v504_v57 = vpop.f32.mrf.mxu0 }

</bundles_post_ra>
